<compile_context>
chip_gen: v7x
topology: tpu7x:2x2x1
jax: 0.10.0
libtpu: 0.0.40
codegen_flags: <defaults>
</compile_context>

<pallas_src>
import functools

import jax
import jax.numpy as jnp
from jax import lax
from jax.experimental import pallas as pl
from jax.experimental.pallas import tpu as pltpu

_LANE_CANDIDATES = (1024, 512, 256, 128)
_BLOCK_ROWS = 512          # 512 x 1024 x 4B = 2 MiB per f32 buffer

# Hash constants (int32 wraparound intended).
_GOLDEN = -1640531527      # 0x9E3779B9
_FMIX1 = -2048144789       # 0x85EBCA6B
_FMIX2 = -1028477587       # 0xC2B2AE35


def _to_i32(v: int) -> int:
    """Wrap a Python int into the signed int32 range."""
    return ((int(v) + 2 ** 31) % 2 ** 32) - 2 ** 31


def _mix32(h):
    """Cheap 2-round multiply/xorshift mixer (counter-based RNG)."""
    h = h * jnp.int32(_FMIX1)
    h = h ^ lax.shift_right_logical(h, jnp.int32(15))
    h = h * jnp.int32(_FMIX2)
    h = h ^ lax.shift_right_logical(h, jnp.int32(13))
    return h


def _mc_dropout_kernel(seed_ref, x_ref, o_ref, *, keep_threshold: int,
                       scale: float, block_rows: int, lanes: int):
    shape = (block_rows, lanes)
    # Scalar offset: grid position + seed mix, computed on the scalar unit.
    off = (pl.program_id(0) * jnp.int32(block_rows * lanes)
           + seed_ref[0] * jnp.int32(_GOLDEN))
    # In-block flat element index.
    idx = (lax.broadcasted_iota(jnp.int32, shape, 0) * jnp.int32(lanes)
           + lax.broadcasted_iota(jnp.int32, shape, 1))
    h = _mix32(idx + off)
    # Signed compare: P(h < T) = (T + 2^31) / 2^32 = 1 - p.
    keep = h < jnp.int32(keep_threshold)
    x = x_ref[...]
    o_ref[...] = jnp.where(keep, x * scale, jnp.zeros_like(x))


def _tail_dropout(tail, start: int, seed_i32: int, keep_threshold: int, scale: float):
    """Plain-jnp path for a small ragged tail; identical hash as the kernel."""
    idx = jnp.arange(tail.shape[0], dtype=jnp.int32) + jnp.int32(_to_i32(start))
    h = _mix32(idx + jnp.int32(seed_i32) * jnp.int32(_GOLDEN))
    keep = h < jnp.int32(keep_threshold)
    return jnp.where(keep, tail * scale, jnp.zeros_like(tail))


def mc_dropout(x: jax.Array, p: float, seed: int) -> jax.Array:
    """MC dropout: always-on inverted dropout with rate p."""
    p = float(p)
    if p <= 0.0:
        return x
    if p >= 1.0:
        return jnp.zeros_like(x)

    orig_shape = x.shape
    dtype = x.dtype
    total = int(x.size)
    if total == 0:
        return x

    scale = 1.0 / (1.0 - p)
    # keep iff (uniform signed int32 hash) < keep_threshold
    thr = int(round((1.0 - p) * float(2 ** 32))) - 2 ** 31
    keep_threshold = max(min(thr, 2 ** 31 - 1), -(2 ** 31))
    seed_i32 = _to_i32(seed)

    xf = x.reshape(-1)

    # Lane-dense width that divides the element count -> no pad/slice copies.
    lanes = next((c for c in _LANE_CANDIDATES if total % c == 0), None)
    if lanes is None:
        lanes = _LANE_CANDIDATES[0]
    bulk = (total // lanes) * lanes

    pieces = []
    if bulk > 0:
        rows = bulk // lanes
        block_rows = rows if rows < _BLOCK_ROWS else _BLOCK_ROWS
        grid = (pl.cdiv(rows, block_rows),)

        seed_arr = jnp.array([seed_i32], dtype=jnp.int32)
        kernel = functools.partial(
            _mc_dropout_kernel,
            keep_threshold=keep_threshold,
            scale=scale,
            block_rows=block_rows,
            lanes=lanes,
        )
        itemsize = jnp.dtype(dtype).itemsize
        x2d = (xf if bulk == total else xf[:bulk]).reshape(rows, lanes)

        out2d = pl.pallas_call(
            kernel,
            out_shape=jax.ShapeDtypeStruct((rows, lanes), dtype),
            grid_spec=pltpu.PrefetchScalarGridSpec(
                num_scalar_prefetch=1,
                grid=grid,
                in_specs=[pl.BlockSpec((block_rows, lanes), lambda i, s: (i, 0))],
                out_specs=pl.BlockSpec((block_rows, lanes), lambda i, s: (i, 0)),
            ),
            compiler_params=pltpu.CompilerParams(
                dimension_semantics=("parallel",),
            ),
            cost_estimate=pl.CostEstimate(
                flops=2 * bulk,
                transcendentals=0,
                bytes_accessed=2 * bulk * itemsize,
            ),
        )(seed_arr, x2d)
        pieces.append(out2d.reshape(-1))

    if bulk < total:
        # Tiny ragged tail (< 1024 elems): handled outside the kernel.
        pieces.append(_tail_dropout(xf[bulk:], bulk, seed_i32, keep_threshold, scale))

    out = pieces[0] if len(pieces) == 1 else jnp.concatenate(pieces)
    return out.reshape(orig_shape)


if __name__ == "__main__":
    key = jax.random.PRNGKey(0)
    # Small NCHW input consistent with a PoViT feature map.
    x = jax.random.normal(key, (2, 4, 16, 16), dtype=jnp.float32)

    p = 0.1
    y = mc_dropout(x, p, seed=1234)
    y = jax.block_until_ready(y)

    assert y.shape == x.shape and y.dtype == x.dtype
    # Surviving elements must equal x / (1 - p) (up to f32 rounding); dropped ones 0.
    nz = y != 0
    assert bool(jnp.all(jnp.where(nz, jnp.abs(y * (1.0 - p) - x) < 1e-5, True)))
    # Drop fraction should be roughly p.
    drop_frac = 1.0 - jnp.mean(nz.astype(jnp.float32))
    assert 0.0 < float(drop_frac) < 0.3

    # Second small case exercising a different lane width (1536 elems -> lanes=512).
    x2 = jax.random.normal(jax.random.PRNGKey(1), (2, 3, 16, 16), dtype=jnp.float32)
    y2 = jax.block_until_ready(mc_dropout(x2, p, seed=7))
    assert y2.shape == x2.shape and y2.dtype == x2.dtype
    nz2 = y2 != 0
    assert bool(jnp.all(jnp.where(nz2, jnp.abs(y2 * (1.0 - p) - x2) < 1e-5, True)))

    print("KERNEL_OK")
</pallas_src>

<mosaic_0001>
module attributes {stable_mosaic.version = 11 : i64} {
  func.func @_mc_dropout_kernel(%arg0: i32, %arg1: memref<1xi32, #tpu.memory_space<smem>>, %arg2: memref<2x1024xf32, #tpu.memory_space<vmem>>, %arg3: memref<2x1024xf32, #tpu.memory_space<vmem>>) attributes {dimension_semantics = [#tpu.dimension_semantics<parallel>], iteration_bounds = array<i64: 1>, scalar_prefetch = 1 : i64, scratch_operands = 0 : i64, tpu.core_type = #tpu.core_type<tc>, window_params = [{transform_indices = @transform_0, window_bounds = array<i64: 2, 1024>}, {transform_indices = @transform_1, window_bounds = array<i64: 2, 1024>}]} {
    %c2048_i32 = arith.constant 2048 : i32
    %0 = arith.muli %arg0, %c2048_i32 : i32
    %c0 = arith.constant 0 : index
    %1 = memref.load %arg1[%c0] : memref<1xi32, #tpu.memory_space<smem>>
    %c-1640531527_i32 = arith.constant -1640531527 : i32
    %2 = arith.muli %1, %c-1640531527_i32 : i32
    %3 = arith.addi %0, %2 : i32
    %4 = tpu.iota {dimensions = array<i32: 0>} : vector<2x1024xi32>
    %c1024_i32 = arith.constant 1024 : i32
    %5 = vector.broadcast %c1024_i32 : i32 to vector<2x1024xi32>
    %6 = arith.muli %4, %5 : vector<2x1024xi32>
    %7 = tpu.iota {dimensions = array<i32: 1>} : vector<2x1024xi32>
    %8 = arith.addi %6, %7 : vector<2x1024xi32>
    %9 = vector.broadcast %3 : i32 to vector<2x1024xi32>
    %10 = arith.addi %8, %9 : vector<2x1024xi32>
    %c-2048144789_i32 = arith.constant -2048144789 : i32
    %11 = vector.broadcast %c-2048144789_i32 : i32 to vector<2x1024xi32>
    %12 = arith.muli %10, %11 : vector<2x1024xi32>
    %c15_i32 = arith.constant 15 : i32
    %13 = vector.broadcast %c15_i32 : i32 to vector<2x1024xi32>
    %14 = arith.shrui %12, %13 : vector<2x1024xi32>
    %15 = arith.xori %12, %14 : vector<2x1024xi32>
    %c-1028477587_i32 = arith.constant -1028477587 : i32
    %16 = vector.broadcast %c-1028477587_i32 : i32 to vector<2x1024xi32>
    %17 = arith.muli %15, %16 : vector<2x1024xi32>
    %c13_i32 = arith.constant 13 : i32
    %18 = vector.broadcast %c13_i32 : i32 to vector<2x1024xi32>
    %19 = arith.shrui %17, %18 : vector<2x1024xi32>
    %20 = arith.xori %17, %19 : vector<2x1024xi32>
    %c1717986918_i32 = arith.constant 1717986918 : i32
    %21 = vector.broadcast %c1717986918_i32 : i32 to vector<2x1024xi32>
    %22 = arith.cmpi slt, %20, %21 : vector<2x1024xi32>
    %c0_0 = arith.constant 0 : index
    %c0_1 = arith.constant 0 : index
    %23 = vector.load %arg2[%c0_0, %c0_1] : memref<2x1024xf32, #tpu.memory_space<vmem>>, vector<2x1024xf32>
    %cst = arith.constant 1.11111116 : f32
    %24 = vector.broadcast %cst : f32 to vector<2x1024xf32>
    %25 = arith.mulf %23, %24 : vector<2x1024xf32>
    %cst_2 = arith.constant 0.000000e+00 : f32
    %26 = vector.broadcast %cst_2 : f32 to vector<2x1024xf32>
    %27 = arith.select %22, %25, %26 : vector<2x1024xi1>, vector<2x1024xf32>
    %c0_3 = arith.constant 0 : index
    %c0_4 = arith.constant 0 : index
    %28 = vector.load %arg3[%c0_3, %c0_4] : memref<2x1024xf32, #tpu.memory_space<vmem>>, vector<2x1024xf32>
    tpu.vector_store %arg3[%c0_3, %c0_4], %27 {strides = array<i32>} : memref<2x1024xf32, #tpu.memory_space<vmem>>, vector<2x1024xf32>,
    return
  }
  func.func @transform_0(%arg0: i32, %arg1: memref<1xi32, #tpu.memory_space<smem>>) -> (i32, i32) {
    %c0_i32 = arith.constant 0 : i32
    %c0_i32_0 = arith.constant 0 : i32
    return %arg0, %c0_i32 : i32, i32
  }
  func.func @transform_1(%arg0: i32, %arg1: memref<1xi32, #tpu.memory_space<smem>>) -> (i32, i32) {
    %c0_i32 = arith.constant 0 : i32
    %c0_i32_0 = arith.constant 0 : i32
    return %arg0, %c0_i32 : i32, i32
  }
}

</mosaic_0001>

<bundles_post_ra>
// kernel: tpu_custom_call.1
= control target key start
LH: loop header
LB: loop body
LE: loop exit
PB: predicated region body
PF: predicated region fallthrough
CT: control target
= control target key end

     0   :  { %8 = vsyncpa [#allocation5], 0  ;;  %s340_s0 = inlined_call_operand.<no memory space> [shape: s32[1], index: 0, kind: input, shape index: {}]   ;;  %s341_s1 = inlined_call_operand.hbm [shape: f32[2,1024], index: 1, kind: input, shape index: {}]   ;;  %s342_s2 = inlined_call_operand.hbm [shape: f32[2,1024], index: 2, kind: output, shape index: {}]  }
   0x1   :  { %9 = vsyncpa [#allocation6], 0  ;;  %s280_s9 = smov [#allocation4]   ;;  %s232_s13 = scalar_lea.hbm %s341_s1, 256 }
   0x2   :  { %s16_s10 = sshll.u32 %s280_s9, 4  ;;  %p233_p0 = scmp.ne.s32.totalorder %s341_s1, %s232_s13  ;;  %s17_s10 = int_to_ptr.vmem [resolvable:$true] %s16_s10 }
   0x3   :  { %p236_p1 = scmp.lt.u32.totalorder %s232_s13, %s341_s1 }
   0x5   :  { %p238_p2 = pnand %p236_p1, %p233_p0 }
   0x7   :  { %241 = shalt.err (!%p238_p2)
}
   0x8   :  { %s242_s18 = scalar_lea.vmem %s17_s10, 256  ;;  %p247_p4 = scmp.lt.s32.totalorder %s17_s10, %s17_s10 }
   0x9   :  { %p243_p3 = scmp.ne.s32.totalorder %s17_s10, %s242_s18  ;;  %p248_p5 = scmp.lt.s32.totalorder %s242_s18, %s242_s18 }
   0xb   :  { %p249_p6 = por %p248_p5, %p247_p4 }
   0xd   :  { %p250_p7 = pnand %p249_p6, %p243_p3 }
   0xf   :  { %253 = shalt.err (!%p250_p7)
}
  0x10   :  { %19 = dma.hbm_to_vmem [thread:$0]  %s341_s1, 256, %s17_s10, [#allocation5]  }
  0x11   :  { %276 = dma.done.wait [#allocation5], 256  }
  0x12   :  { %277 = vsyncadd [#allocation5], 4294967040  ;;  %s25_s23 = smul.u32 2654435769, %s340_s0  ;;  %v27_v0 = vlaneseq  ;;  %v281_v1 = vmov 1983009808  }
  0x13   :  { %v120_v2 = vunpack.c.l.s4 %v281_v1  ;;  %v112_v19 = vld [vmem:[#allocation4] sm:$0xff]  ;;  %v113_v24 = vld [vmem:[#allocation4 + $0x8] sm:$0xff]  ;;  %s282_s0 = smov [#allocation7]  }
  0x14   :  { %v28_v3 = vshrl.u32 %v27_v0, 7  ;;  %v31_v4 = vand.u32 127, %v27_v0  ;;  %v47_v5 = vstv %s25_s23  ;;  %v114_v29 = vmul.f32 1.1111112, %v112_v19  ;;  %s220_s1 = sshll.u32 %s282_s0, 4  ;;  %s221_s1 = int_to_ptr.vmem [resolvable:$true] %s220_s1 }
  0x15   :  { %v121_v6 = vunpack.c.0.s8 %v120_v2  ;;  %v315_v36 = vmul.f32 1.1111112, %v113_v24  ;;  %s254_s24 = scalar_lea.vmem %s221_s1, 256  ;;  %p259_p9 = scmp.lt.s32.totalorder %s221_s1, %s221_s1 }
  0x16   :  { %v29_v7 = vmul.u32 1024, %v28_v3  ;;  %v32_v8 = vadd.s32 128, %v31_v4  ;;  %v33_v9 = vadd.s32 256, %v31_v4  ;;  %v34_v10 = vadd.s32 384, %v31_v4  ;;  %p255_p8 = scmp.ne.s32.totalorder %s221_s1, %s254_s24  ;;  %p260_p10 = scmp.lt.s32.totalorder %s254_s24, %s254_s24 }
  0x17   :  { %v313_v11 = vsub.s32 %v121_v6, %v28_v3  ;;  %v35_v12 = vadd.s32 512, %v31_v4  ;;  %v36_v13 = vadd.s32 640, %v31_v4  ;;  %v37_v14 = vadd.s32 768, %v31_v4 }
  0x18   :  { %v39_v15 = vadd.s32 %v31_v4, %v29_v7  ;;  %v40_v16 = vadd.s32 %v32_v8, %v29_v7  ;;  %v41_v17 = vadd.s32 %v33_v9, %v29_v7  ;;  %v42_v18 = vadd.s32 %v34_v10, %v29_v7  ;;  %p261_p11 = por %p260_p10, %p259_p9 }
  0x19   :  { %v38_v20 = vadd.s32 896, %v31_v4  ;;  %v43_v21 = vadd.s32 %v35_v12, %v29_v7  ;;  %v44_v22 = vadd.s32 %v36_v13, %v29_v7  ;;  %v45_v23 = vadd.s32 %v37_v14, %v29_v7 }
  0x1a   :  { %v48_v25 = vadd.s32 %v47_v5, %v39_v15  ;;  %v49_v26 = vadd.s32 %v47_v5, %v40_v16  ;;  %v50_v27 = vadd.s32 %v47_v5, %v41_v17  ;;  %v51_v28 = vadd.s32 %v47_v5, %v42_v18  ;;  %p262_p12 = pnand %p261_p11, %p255_p8 }
  0x1b   :  { %v46_v30 = vadd.s32 %v38_v20, %v29_v7  ;;  %v52_v31 = vadd.s32 %v47_v5, %v43_v21  ;;  %v53_v32 = vadd.s32 %v47_v5, %v44_v22  ;;  %v54_v35 = vadd.s32 %v47_v5, %v45_v23 }
  0x1c   :  { %v56_v33 = vmul.u32 2246822507, %v48_v25  ;;  %v57_v34 = vmul.u32 2246822507, %v49_v26  ;;  %v118_v39 = vcombine.high %v114_v29, %v114_v29  ;;  %v125_v40 = vrot.slane %v114_v29, %v313_v11 }
  0x1d   :  { %v58_v37 = vmul.u32 2246822507, %v50_v27  ;;  %v59_v38 = vmul.u32 2246822507, %v51_v28  ;;  %v55_v43 = vadd.s32 %v47_v5, %v46_v30 }
  0x1e   :  { %v64_v41 = vshrl.u32 %v56_v33, 15  ;;  %v65_v42 = vshrl.u32 %v57_v34, 15  ;;  %v60_v44 = vmul.u32 2246822507, %v52_v31  ;;  %v132_v47 = vrot.slane %v118_v39, %v313_v11 }
  0x1f   :  { %v66_v45 = vshrl.u32 %v58_v37, 15  ;;  %v67_v46 = vshrl.u32 %v59_v38, 15  ;;  %v133_v48 = vcombine.high %v125_v40, %v125_v40  ;;  %v61_v51 = vmul.u32 2246822507, %v53_v32 }
  0x20   :  { %v72_v49 = vxor.u32 %v64_v41, %v56_v33  ;;  %v73_v50 = vxor.u32 %v65_v42, %v57_v34  ;;  %v62_v52 = vmul.u32 2246822507, %v54_v35  ;;  %v134_v55 = vcombine.high %v132_v47, %v132_v47 }
  0x21   :  { %v74_v53 = vxor.u32 %v66_v45, %v58_v37  ;;  %v75_v54 = vxor.u32 %v67_v46, %v59_v38  ;;  %v63_v56 = vmul.u32 2246822507, %v55_v43  ;;  %v68_v59 = vshrl.u32 %v60_v44, 15 }
  0x22   :  { %v80_v57 = vmul.u32 3266489709, %v72_v49  ;;  %v81_v58 = vmul.u32 3266489709, %v73_v50  ;;  %v69_v60 = vshrl.u32 %v61_v51, 15  ;;  %v70_v63 = vshrl.u32 %v62_v52, 15 }
  0x23   :  { %v82_v61 = vmul.u32 3266489709, %v74_v53  ;;  %v83_v62 = vmul.u32 3266489709, %v75_v54  ;;  %v71_v0 = vshrl.u32 %v63_v56, 15  ;;  %v76_v3 = vxor.u32 %v68_v59, %v60_v44 }
  0x24   :  { %v88_v1 = vshrl.u32 %v80_v57, 13  ;;  %v89_v2 = vshrl.u32 %v81_v58, 13  ;;  %v77_v4 = vxor.u32 %v69_v60, %v61_v51  ;;  %v78_v7 = vxor.u32 %v70_v63, %v62_v52 }
  0x25   :  { %v90_v5 = vshrl.u32 %v82_v61, 13  ;;  %v91_v6 = vshrl.u32 %v83_v62, 13  ;;  %v79_v8 = vxor.u32 %v71_v0, %v63_v56  ;;  %v84_v12 = vmul.u32 3266489709, %v76_v3 }
  0x26   :  { %v96_v9 = vxor.u32 %v88_v1, %v80_v57  ;;  %v97_v10 = vxor.u32 %v89_v2, %v81_v58  ;;  %v85_v13 = vmul.u32 3266489709, %v77_v4  ;;  %v86_v16 = vmul.u32 3266489709, %v78_v7 }
  0x27   :  { %v98_v14 = vxor.u32 %v90_v5, %v82_v61  ;;  %v99_v15 = vxor.u32 %v91_v6, %v83_v62  ;;  %v87_v17 = vmul.u32 3266489709, %v79_v8  ;;  %v92_v18 = vshrl.u32 %v84_v12, 13 }
  0x28   :  { %vm104_vm0 = vcmp.lt.s32.totalorder %v96_v9, 1717986918  ;;  %vm105_vm1 = vcmp.lt.s32.totalorder %v97_v10, 1717986918  ;;  %v93_v19 = vshrl.u32 %v85_v13, 13  ;;  %v94_v25 = vshrl.u32 %v86_v16, 13 }
  0x29   :  { %vm106_vm2 = vcmp.lt.s32.totalorder %v98_v14, 1717986918  ;;  %vm107_vm3 = vcmp.lt.s32.totalorder %v99_v15, 1717986918  ;;  %v160_v20 = vsel %vm104_vm0, %v125_v40, 0.0  ;;  %v161_v21 = vsel %vm105_vm1, %v133_v48, 0.0 }
  0x2a   :  { %v162_v22 = vsel %vm106_vm2, %v132_v47, 0.0  ;;  %v163_v23 = vsel %vm107_vm3, %v134_v55, 0.0  ;;  %v176_v24 = vcombine.low %v160_v20, %v161_v21  ;;  %v95_v27 = vshrl.u32 %v87_v17, 13 }
  0x2b   :  { %v177_v26 = vcombine.low %v162_v22, %v163_v23  ;;  %v100_v28 = vxor.u32 %v92_v18, %v84_v12  ;;  %v101_v29 = vxor.u32 %v93_v19, %v85_v13  ;;  %v102_v31 = vxor.u32 %v94_v25, %v86_v16 }
  0x2c   :  { %v184_v30 = vrot.slane %v176_v24, %v313_v11  ;;  %v135_v32 = vcombine.high %v315_v36, %v315_v36  ;;  %v142_v33 = vrot.slane %v315_v36, %v313_v11  ;;  %v103_v35 = vxor.u32 %v95_v27, %v87_v17 }
  0x2d   :  { %v191_v34 = vrot.slane %v177_v26, %v313_v11  ;;  %vm108_vm4 = vcmp.lt.s32.totalorder %v100_v28, 1717986918  ;;  %vm109_vm5 = vcmp.lt.s32.totalorder %v101_v29, 1717986918  ;;  %vm110_vm6 = vcmp.lt.s32.totalorder %v102_v31, 1717986918 }
  0x2e   :  { %v149_v37 = vrot.slane %v135_v32, %v313_v11  ;;  %v150_v38 = vcombine.high %v142_v33, %v142_v33  ;;  %v164_v39 = vsel %vm108_vm4, %v142_v33, 0.0  ;;  %vm111_vm7 = vcmp.lt.s32.totalorder %v103_v35, 1717986918 }
  0x2f   :  { %v192_v40 = vcombine.low %v184_v30, %v191_v34 }
  0x30   :  { %v151_v41 = vcombine.high %v149_v37, %v149_v37  ;;  %v165_v42 = vsel %vm109_vm5, %v150_v38, 0.0  ;;  %v166_v43 = vsel %vm110_vm6, %v149_v37, 0.0 }
  0x31   :  { %212 = vst [vmem:[#allocation7] sm:$0xff] %v192_v40  ;;  %v193_v44 = vcombine.low %v164_v39, %v165_v42 }
  0x32   :  { %v167_v45 = vsel %vm111_vm7, %v151_v41, 0.0 }
  0x33   :  { %v194_v46 = vcombine.low %v166_v43, %v167_v45  ;;  %v201_v36 = vrot.slane %v193_v44, %v313_v11 }
  0x35   :  { %v208_v47 = vrot.slane %v194_v46, %v313_v11 }
  0x37   :  { %v209_v48 = vcombine.low %v201_v36, %v208_v47 }
  0x39   :  { %213 = vst [vmem:[#allocation7 + $0x8] sm:$0xff] %v209_v48 }
  0x3a   :  { %265 = shalt.err (!%p262_p12)
}
  0x3b   :  { %s266_s27 = scalar_lea.hbm %s342_s2, 256 }
  0x3c   :  { %p267_p13 = scmp.ne.s32.totalorder %s342_s2, %s266_s27  ;;  %p270_p0 = scmp.lt.u32.totalorder %s266_s27, %s342_s2 }
  0x3e   :  { %p272_p1 = pnand %p270_p0, %p267_p13 }
  0x40   :  { %275 = shalt.err (!%p272_p1)
}
  0x41   :  { %223 = dma.vmem_to_hbm [thread:$0]  %s221_s1, 256, %s342_s2, [#allocation6]  }
  0x42   :  { %278 = dma.done.wait [#allocation6], 256  }
  0x43   :  { %279 = vsyncadd [#allocation6], 4294967040 }
  0x44   :  { %227 = vsyncpa [#allocation5], 1 }
  0x45   :  { %228 = vsyncpa [#allocation6], 1 }

</bundles_post_ra>
